<compile_context>
chip_gen: v5e
topology: v5e:2x2
jax: 0.10.0
libtpu: 0.0.40
codegen_flags: <defaults>
</compile_context>

<pallas_src>
import math

import jax
import jax.numpy as jnp
from jax.experimental import pallas as pl
from jax.experimental.pallas import tpu as pltpu

SAMPLE_RATE = 16000
N_FFT = 400
WIN_LENGTH = 400
HOP_LENGTH = 200
N_FREQS = N_FFT // 2 + 1          # 201
N_FREQS_PAD = 256                 # lane/MXU aligned frequency axis
N_MELS = 128
N_MFCC = 40
N_OUT_PAD = 128                   # lane-dense output width (sliced to 40 outside)
POWER_MULT = 10.0                 # AmplitudeToDB("power") multiplier
AMIN = 1e-10
TOP_DB = 80.0

MAX_TILE_BT = 1024                # rows per grid step (fits v5e/v6e/v7x comfortably)


def _round_up(x, m):
    return (x + m - 1) // m * m


# ----------------------------- parameter construction (glue) -----------------------------

def _hann_window_periodic(n):
    i = jnp.arange(n, dtype=jnp.float32)
    return 0.5 - 0.5 * jnp.cos(2.0 * jnp.pi * i / n)


def _windowed_dft_matrix():
    # (n_fft, 2*N_FREQS_PAD) = [ hann*cos | hann*sin ], freq axis zero-padded 201 -> 256.
    n = jnp.arange(N_FFT, dtype=jnp.float32)[:, None]
    k = jnp.arange(N_FREQS, dtype=jnp.float32)[None, :]
    ang = 2.0 * jnp.pi * n * k / N_FFT
    pad = ((0, 0), (0, N_FREQS_PAD - N_FREQS))
    cos_m = jnp.pad(jnp.cos(ang), pad)
    sin_m = jnp.pad(jnp.sin(ang), pad)
    win = _hann_window_periodic(WIN_LENGTH)[:, None]
    return (win * jnp.concatenate([cos_m, sin_m], axis=1)).astype(jnp.float32)


def _mel_filterbank_padded():
    # torchaudio melscale_fbanks: HTK mel scale, norm=None -> (n_freqs, n_mels),
    # zero-padded along the frequency (K) axis 201 -> 256 for aligned MXU tiles.
    def hz_to_mel(f):
        return 2595.0 * jnp.log10(1.0 + f / 700.0)

    def mel_to_hz(m):
        return 700.0 * (jnp.power(10.0, m / 2595.0) - 1.0)

    f_min, f_max = 0.0, SAMPLE_RATE / 2.0
    all_freqs = jnp.linspace(0.0, SAMPLE_RATE / 2.0, N_FREQS)
    m_pts = jnp.linspace(hz_to_mel(f_min), hz_to_mel(f_max), N_MELS + 2)
    f_pts = mel_to_hz(m_pts)
    f_diff = f_pts[1:] - f_pts[:-1]                       # (n_mels+1,)
    slopes = f_pts[None, :] - all_freqs[:, None]          # (n_freqs, n_mels+2)
    down = -slopes[:, :-2] / f_diff[:-1]
    up = slopes[:, 2:] / f_diff[1:]
    fb = jnp.maximum(0.0, jnp.minimum(down, up))
    return jnp.pad(fb, ((0, N_FREQS_PAD - N_FREQS), (0, 0))).astype(jnp.float32)


def _dct_matrix_padded():
    # torchaudio.functional.create_dct(n_mfcc, n_mels, norm="ortho") -> (n_mels, n_mfcc),
    # zero-padded to (n_mels, 128) so the kernel output is lane-dense.
    n = jnp.arange(N_MELS, dtype=jnp.float32)
    k = jnp.arange(N_MFCC, dtype=jnp.float32)[:, None]
    dct = jnp.cos(math.pi / N_MELS * (n + 0.5) * k)       # (n_mfcc, n_mels)
    dct = dct.at[0].multiply(1.0 / math.sqrt(2.0))
    dct = (dct * math.sqrt(2.0 / N_MELS)).T               # (n_mels, n_mfcc)
    return jnp.pad(dct, ((0, 0), (0, N_OUT_PAD - N_MFCC))).astype(jnp.float32)


# ----------------------------------- Pallas kernels ---------------------------------------

def _melspec_db_kernel(frames_ref, dft_ref, mel_ref, db_ref):
    # frames_ref: (TILE, 400), dft_ref: (400, 512), mel_ref: (256, 128), db_ref: (TILE, 128)
    # Hann window is folded into dft_ref; [cos|sin] fused into one MXU matmul.
    y = jnp.dot(frames_ref[...], dft_ref[...], preferred_element_type=jnp.float32)
    re = y[:, :N_FREQS_PAD]
    im = y[:, N_FREQS_PAD:]
    power = re * re + im * im                             # |X|^2, zero in padded lanes
    mel = jnp.dot(power, mel_ref[...], preferred_element_type=jnp.float32)
    # AmplitudeToDB("power") without the top_db clamp (needs the global max -> second pass).
    db_ref[...] = POWER_MULT * jnp.log10(jnp.maximum(mel, AMIN))


def _clamp_dct_kernel(gmax_ref, db_ref, dct_ref, out_ref):
    # gmax_ref: (1,1) SMEM scalar = global max dB over the whole batch (torchaudio folds
    # leading dims, so the top_db reference is global for a (B, n_mels, T) mel spectrogram).
    floor = gmax_ref[0, 0] - TOP_DB
    db = jnp.maximum(db_ref[...], floor)
    # DCT-II (ortho), output padded to 128 lanes (columns 40..127 are exactly zero).
    out_ref[...] = jnp.dot(db, dct_ref[...], preferred_element_type=jnp.float32)


# -------------------------------------- wrapper -------------------------------------------

@jax.jit
def mfcc(x):
    """x: (L,) or (B, L) float32 waveform -> (B, n_mfcc, T) like torchaudio MFCC."""
    if x.ndim == 1:
        x = x[None, :]
    x = x.astype(jnp.float32)
    B, L = x.shape
    T = 1 + L // HOP_LENGTH

    # center=True reflect padding + overlap framing via two contiguous slices (no gather).
    pad = N_FFT // 2
    xp = jnp.pad(x, ((0, 0), (pad, pad)), mode="reflect")                 # (B, L + n_fft)
    lo = xp[:, : T * HOP_LENGTH].reshape(B, T, HOP_LENGTH)
    hi = xp[:, HOP_LENGTH : HOP_LENGTH + T * HOP_LENGTH].reshape(B, T, HOP_LENGTH)
    frames = jnp.concatenate([lo, hi], axis=-1).reshape(B * T, N_FFT)     # (B*T, 400)
    # TODO(synk): build the overlapping frames in-kernel from the chunked waveform
    # (manual DMA from a pl.ANY ref) to avoid the 2x waveform duplication in HBM.

    BT = B * T
    tile_bt = min(MAX_TILE_BT, _round_up(BT, 8))
    bt_pad = _round_up(BT, tile_bt)
    if bt_pad != BT:
        frames = jnp.pad(frames, ((0, bt_pad - BT), (0, 0)))
    num_tiles = bt_pad // tile_bt

    dft_m = _windowed_dft_matrix()        # (400, 512)
    mel_fb = _mel_filterbank_padded()     # (256, 128)
    dct_m = _dct_matrix_padded()          # (128, 128)

    cparams = pltpu.CompilerParams(
        dimension_semantics=("parallel",),
        vmem_limit_bytes=32 * 1024 * 1024,
    )

    # Pass 1: heavy fused kernel -> un-clamped mel-dB (bt_pad, 128).
    db = pl.pallas_call(
        _melspec_db_kernel,
        out_shape=jax.ShapeDtypeStruct((bt_pad, N_MELS), jnp.float32),
        grid=(num_tiles,),
        in_specs=[
            pl.BlockSpec((tile_bt, N_FFT), lambda i: (i, 0)),
            pl.BlockSpec((N_FFT, 2 * N_FREQS_PAD), lambda i: (0, 0)),
            pl.BlockSpec((N_FREQS_PAD, N_MELS), lambda i: (0, 0)),
        ],
        out_specs=pl.BlockSpec((tile_bt, N_MELS), lambda i: (i, 0)),
        compiler_params=cparams,
    )(frames, dft_m, mel_fb)

    # Global top_db reference (padded rows contribute exactly -100 dB, never above the max).
    gmax = jnp.max(db).reshape(1, 1)

    # Pass 2: top_db clamp + DCT, lane-dense 128-wide output.
    out = pl.pallas_call(
        _clamp_dct_kernel,
        out_shape=jax.ShapeDtypeStruct((bt_pad, N_OUT_PAD), jnp.float32),
        grid=(num_tiles,),
        in_specs=[
            pl.BlockSpec(memory_space=pltpu.MemorySpace.SMEM),
            pl.BlockSpec((tile_bt, N_MELS), lambda i: (i, 0)),
            pl.BlockSpec((N_MELS, N_OUT_PAD), lambda i: (0, 0)),
        ],
        out_specs=pl.BlockSpec((tile_bt, N_OUT_PAD), lambda i: (i, 0)),
        compiler_params=cparams,
    )(gmax, db, dct_m)

    # (bt_pad, 128) -> (B, n_mfcc, T) to match torchaudio axis convention.
    return out[:BT, :N_MFCC].reshape(B, T, N_MFCC).transpose(0, 2, 1)


if __name__ == "__main__":
    key = jax.random.PRNGKey(0)
    B, L = 2, 800                      # -> T = 1 + 800 // 200 = 5 frames
    x = jax.random.normal(key, (B, L), dtype=jnp.float32)

    y = mfcc(x)
    y = jax.block_until_ready(y)

    assert y.shape == (B, N_MFCC, 1 + L // HOP_LENGTH), y.shape
    assert y.dtype == jnp.float32
    assert bool(jnp.all(jnp.isfinite(y)))
    print("KERNEL_OK")
</pallas_src>

<mosaic_0001>
module attributes {stable_mosaic.version = 11 : i64} {
  func.func @_melspec_db_kernel(%arg0: i32, %arg1: memref<16x400xf32, #tpu.memory_space<vmem>>, %arg2: memref<400x512xf32, #tpu.memory_space<vmem>>, %arg3: memref<256x128xf32, #tpu.memory_space<vmem>>, %arg4: memref<16x128xf32, #tpu.memory_space<vmem>>) attributes {dimension_semantics = [#tpu.dimension_semantics<parallel>], iteration_bounds = array<i64: 1>, scalar_prefetch = 0 : i64, scratch_operands = 0 : i64, tpu.core_type = #tpu.core_type<tc>, window_params = [{transform_indices = @transform_0, window_bounds = array<i64: 16, 400>}, {pipeline_mode = #tpu.pipeline_mode<synchronous>, transform_indices = @transform_1, window_bounds = array<i64: 400, 512>}, {pipeline_mode = #tpu.pipeline_mode<synchronous>, transform_indices = @transform_2, window_bounds = array<i64: 256, 128>}, {transform_indices = @transform_3, window_bounds = array<i64: 16, 128>}]} {
    %c0 = arith.constant 0 : index
    %c0_0 = arith.constant 0 : index
    %0 = vector.load %arg1[%c0, %c0_0] : memref<16x400xf32, #tpu.memory_space<vmem>>, vector<16x400xf32>
    %c0_1 = arith.constant 0 : index
    %c0_2 = arith.constant 0 : index
    %1 = vector.load %arg2[%c0_1, %c0_2] : memref<400x512xf32, #tpu.memory_space<vmem>>, vector<400x512xf32>
    %cst = arith.constant dense<0.000000e+00> : vector<16x512xf32>
    %2 = tpu.matmul %0, %1, %cst {dimension_numbers = #tpu.dot_dimension_numbers<[1], [0], [0], [1], [0, 0, 1, 1], [], []>} : vector<16x400xf32>, vector<400x512xf32>, vector<16x512xf32> -> vector<16x512xf32>
    %3 = vector.extract_strided_slice %2 {offsets = [0, 0], sizes = [16, 256], strides = [1, 1]} : vector<16x512xf32> to vector<16x256xf32>
    %4 = vector.extract_strided_slice %2 {offsets = [0, 256], sizes = [16, 256], strides = [1, 1]} : vector<16x512xf32> to vector<16x256xf32>
    %5 = arith.mulf %3, %3 : vector<16x256xf32>
    %6 = arith.mulf %4, %4 : vector<16x256xf32>
    %7 = arith.addf %5, %6 : vector<16x256xf32>
    %c0_3 = arith.constant 0 : index
    %c0_4 = arith.constant 0 : index
    %8 = vector.load %arg3[%c0_3, %c0_4] : memref<256x128xf32, #tpu.memory_space<vmem>>, vector<256x128xf32>
    %cst_5 = arith.constant dense<0.000000e+00> : vector<16x128xf32>
    %9 = tpu.matmul %7, %8, %cst_5 {dimension_numbers = #tpu.dot_dimension_numbers<[1], [0], [0], [1], [0, 0, 1, 1], [], []>} : vector<16x256xf32>, vector<256x128xf32>, vector<16x128xf32> -> vector<16x128xf32>
    %cst_6 = arith.constant 1.000000e-10 : f32
    %10 = vector.broadcast %cst_6 : f32 to vector<16x128xf32>
    %11 = arith.maximumf %9, %10 : vector<16x128xf32>
    %12 = math.log %11 : vector<16x128xf32>
    %cst_7 = arith.constant 0.434294492 : f32
    %13 = vector.broadcast %cst_7 : f32 to vector<16x128xf32>
    %14 = arith.mulf %12, %13 : vector<16x128xf32>
    %cst_8 = arith.constant 1.000000e+01 : f32
    %15 = vector.broadcast %cst_8 : f32 to vector<16x128xf32>
    %16 = arith.mulf %15, %14 : vector<16x128xf32>
    %c0_9 = arith.constant 0 : index
    %c0_10 = arith.constant 0 : index
    %17 = vector.load %arg4[%c0_9, %c0_10] : memref<16x128xf32, #tpu.memory_space<vmem>>, vector<16x128xf32>
    tpu.vector_store %arg4[%c0_9, %c0_10], %16 {strides = array<i32>} : memref<16x128xf32, #tpu.memory_space<vmem>>, vector<16x128xf32>,
    return
  }
  func.func @transform_0(%arg0: i32) -> (i32, i32) {
    %c0_i32 = arith.constant 0 : i32
    %c0_i32_0 = arith.constant 0 : i32
    return %arg0, %c0_i32 : i32, i32
  }
  func.func @transform_1(%arg0: i32) -> (i32, i32) {
    %c0_i32 = arith.constant 0 : i32
    %c0_i32_0 = arith.constant 0 : i32
    %c0_i32_1 = arith.constant 0 : i32
    return %c0_i32, %c0_i32_0 : i32, i32
  }
  func.func @transform_2(%arg0: i32) -> (i32, i32) {
    %c0_i32 = arith.constant 0 : i32
    %c0_i32_0 = arith.constant 0 : i32
    %c0_i32_1 = arith.constant 0 : i32
    return %c0_i32, %c0_i32_0 : i32, i32
  }
  func.func @transform_3(%arg0: i32) -> (i32, i32) {
    %c0_i32 = arith.constant 0 : i32
    %c0_i32_0 = arith.constant 0 : i32
    return %arg0, %c0_i32 : i32, i32
  }
}

module attributes {stable_mosaic.version = 11 : i64} {
  func.func @_clamp_dct_kernel(%arg0: i32, %arg1: memref<1x1xf32, #tpu.memory_space<smem>>, %arg2: memref<16x128xf32, #tpu.memory_space<vmem>>, %arg3: memref<128x128xf32, #tpu.memory_space<vmem>>, %arg4: memref<16x128xf32, #tpu.memory_space<vmem>>) attributes {dimension_semantics = [#tpu.dimension_semantics<parallel>], iteration_bounds = array<i64: 1>, scalar_prefetch = 0 : i64, scratch_operands = 0 : i64, tpu.core_type = #tpu.core_type<tc>, window_params = [{transform_indices = @transform_0, window_bounds = array<i64: 1, 1>}, {transform_indices = @transform_1, window_bounds = array<i64: 16, 128>}, {pipeline_mode = #tpu.pipeline_mode<synchronous>, transform_indices = @transform_2, window_bounds = array<i64: 128, 128>}, {transform_indices = @transform_3, window_bounds = array<i64: 16, 128>}]} {
    %c0 = arith.constant 0 : index
    %c0_0 = arith.constant 0 : index
    %0 = memref.load %arg1[%c0, %c0_0] : memref<1x1xf32, #tpu.memory_space<smem>>
    %cst = arith.constant 8.000000e+01 : f32
    %1 = arith.subf %0, %cst : f32
    %c0_1 = arith.constant 0 : index
    %c0_2 = arith.constant 0 : index
    %2 = vector.load %arg2[%c0_1, %c0_2] : memref<16x128xf32, #tpu.memory_space<vmem>>, vector<16x128xf32>
    %3 = vector.broadcast %1 : f32 to vector<16x128xf32>
    %4 = arith.maximumf %2, %3 : vector<16x128xf32>
    %c0_3 = arith.constant 0 : index
    %c0_4 = arith.constant 0 : index
    %5 = vector.load %arg3[%c0_3, %c0_4] : memref<128x128xf32, #tpu.memory_space<vmem>>, vector<128x128xf32>
    %cst_5 = arith.constant dense<0.000000e+00> : vector<16x128xf32>
    %6 = tpu.matmul %4, %5, %cst_5 {dimension_numbers = #tpu.dot_dimension_numbers<[1], [0], [0], [1], [0, 0, 1, 1], [], []>} : vector<16x128xf32>, vector<128x128xf32>, vector<16x128xf32> -> vector<16x128xf32>
    %c0_6 = arith.constant 0 : index
    %c0_7 = arith.constant 0 : index
    %7 = vector.load %arg4[%c0_6, %c0_7] : memref<16x128xf32, #tpu.memory_space<vmem>>, vector<16x128xf32>
    tpu.vector_store %arg4[%c0_6, %c0_7], %6 {strides = array<i32>} : memref<16x128xf32, #tpu.memory_space<vmem>>, vector<16x128xf32>,
    return
  }
  func.func @transform_0(%arg0: i32) -> (i32, i32) {
    %c0_i32 = arith.constant 0 : i32
    %c0_i32_0 = arith.constant 0 : i32
    %c0_i32_1 = arith.constant 0 : i32
    return %c0_i32, %c0_i32_0 : i32, i32
  }
  func.func @transform_1(%arg0: i32) -> (i32, i32) {
    %c0_i32 = arith.constant 0 : i32
    %c0_i32_0 = arith.constant 0 : i32
    return %arg0, %c0_i32 : i32, i32
  }
  func.func @transform_2(%arg0: i32) -> (i32, i32) {
    %c0_i32 = arith.constant 0 : i32
    %c0_i32_0 = arith.constant 0 : i32
    %c0_i32_1 = arith.constant 0 : i32
    return %c0_i32, %c0_i32_0 : i32, i32
  }
  func.func @transform_3(%arg0: i32) -> (i32, i32) {
    %c0_i32 = arith.constant 0 : i32
    %c0_i32_0 = arith.constant 0 : i32
    return %arg0, %c0_i32 : i32, i32
  }
}

</mosaic_0001>

<bundles_post_ra>
// kernel: reverse.1
= control target key start
LH: loop header
LB: loop body
LE: loop exit
PB: predicated region body
PF: predicated region fallthrough
CT: control target
= control target key end

     0   :  { %v2_v0 = vlaneseq  ;;  %s315_s0 = inlined_call_operand.vmem [shape: f32[2,256], index: 0, kind: input, shape index: {}]   ;;  %s316_s1 = inlined_call_operand.vmem [shape: f32[2,256], index: 1, kind: output, shape index: {}]  }
   0x2   :  { %v3_v1 = vsub.s32 127, %v2_v0 }
   0x4   :  { %4 = vset.pattern.permute.xlu0 %v3_v1 }
   0x5   :  { %s275_s6 = smov 0   ;;  %s277_s7 = smov 0  }
   0x6   :  { %s279_s8 = smov 0  }
   0x7 LB: > { %s205_s9 = sadd.s32 4294967295, %s263_s8   ;;  %s19_s10 = sadd.s32 1, %s259_s7  ;;  %s263_s8 = sphi %s279_s8, %s10_s8   ;;  %s259_s7 = sphi %s277_s7, %s318_s7   ;;  %s255_s6 = sphi %s275_s6, %s317_s6  }
   0x8   : > { %p20_p0 = scmp.ge.s32.totalorder %s19_s10, 2  ;;  %p207_p1 = scmp.ge.s32.totalorder %s263_s8, 2 }
   0x9   : > { %s38_s11 = sand.u32 (!%p207_p1), 1, %s263_s8   ;;  %s41_s12 = ssub.s32 (!%p207_p1), 1, %s259_s7 }
   0xa   : > { %s320_s10 = smov (%p20_p0, %s19_s10), 0  ;;  %36 = sbr.rel (%p207_p1) target bundleno = 17 (0x11), region = 16 }
   0xb   : > { %s208_s13 = sshll.u32 (!%p207_p1), %s38_s11, 1  ;;  %s209_s14 = sshll.u32 (!%p207_p1), %s41_s12, 1 }
   0xc   : > { %s45_s17 = scalar_lea.vmem (!%p207_p1), %s315_s0, %s209_s14  ;;  %s40_s18 = scalar_lea.vmem (!%p207_p1), [#allocation1], %s208_s13 }
   0xf   : > { %v62_v2 = vld [vmem:[%s45_s17] sm:$0x3] }
  0x10   : > { %63 = vst [vmem:[%s40_s18] sm:$0x3] %v62_v2 }
  0x11 PF: > { %p210_p2 = scmp.ge.s32.totalorder %s263_s8, 1  ;;  %p80_p3 = scmp.lt.s32.totalorder %s263_s8, 3 }
  0x13   : > { %p81_p4 = pnand %p210_p2, %p80_p3 }
  0x14   : > { %s91_s19 = sand.u32 (!%p81_p4), 1, %s205_s9   ;;  %s214_s23 = sshll.u32 (!%p81_p4), %s255_s6, 1 }
  0x15   : > { %84 = sbr.rel (%p81_p4) target bundleno = 167 (0xa7), region = 50  ;;  %s211_s20 = sshll.u32 (!%p81_p4), %s91_s19, 1 }
  0x16   : > { %s93_s21 = scalar_lea.vmem (!%p81_p4), [#allocation1], %s211_s20  ;;  %s97_s22 = scalar_lea.vmem (!%p81_p4), [#allocation3], %s211_s20 }
  0x17   : > { %s120_s26 = scalar_lea.vmem (!%p81_p4), %s316_s1, %s214_s23 }
  0x1a   : > { %v100_v3 = vld [vmem:[%s93_s21] sm:$0x3] }
  0x1b   : > { %101 = vst [vmem:[#allocation0] sm:$0x3] %v100_v3 }
  0x22   : > { %v103_v4 = vld [vmem:[#allocation0] sm:$0xff] }
  0x23   : > { %104 = vperm.xlu0 %4, %v103_v4  }
  0x95   : > { %v105_v5 = vpop.permute.xlu0 %104 }
  0x96   : > { %106 = vst [vmem:[#allocation2] sm:$0xff] %v105_v5 }
  0x9d   : > { %v109_v6 = vld [vmem:[#allocation2] sm:$0x3] }
  0x9e   : > { %112 = vst [vmem:[%s97_s22] sm:$0x3] %v109_v6 }
  0xa5   : > { %v137_v7 = vld [vmem:[%s97_s22] sm:$0x3] }
  0xa6   : > { %138 = vst [vmem:[%s120_s26] sm:$0x3] %v137_v7 }
  0xa7 PF: > { %s10_s8 = sadd.s32 1, %s263_s8   ;;  %s317_s6 = smov %s259_s7 }
  0xa8   : > { %p7_p5 = scmp.ge.s32.totalorder %s10_s8, 4   ;;  %s318_s7 = smov %s320_s10 }
  0xaa   :  { %9 = sbr.rel (!%p7_p5) target bundleno = 7 (0x7), region = 110 }

// kernel: mfcc.2
= control target key start
LH: loop header
LB: loop body
LE: loop exit
PB: predicated region body
PF: predicated region fallthrough
CT: control target
= control target key end

     0   :  { %vm222_vm0 = vcmask 130048   ;;  %s1544_s1 = inlined_call_operand.vmem [shape: f32[400,512], index: 1, kind: input, shape index: {}]   ;;  %s1545_s0 = inlined_call_operand.vmem [shape: f32[16,400], index: 0, kind: input, shape index: {}]   ;;  %s1546_s2 = inlined_call_operand.vmem [shape: f32[256,128], index: 2, kind: input, shape index: {}]   ;;  %s1547_s3 = inlined_call_operand.vmem [shape: f32[16,128], index: 3, kind: output, shape index: {}]  }
   0x1   :  { %v82_v0 = vld [vmem:[%s1544_s1 + $0x1e0] sm:$0xff]  ;;  %v83_v4 = vld [vmem:[%s1544_s1 + $0x1e8] sm:$0xff]  ;;  %v921_v61 = vld [vmem:[%s1545_s0 + $0x10] sm:$0xff] }
   0x2   :  { %v210_v1 = vld [vmem:[%s1544_s1 + $0x5e0] sm:$0xff]  ;;  %229 = vmatpush.msra.mxu0 %v82_v0  ;;  %321 = vmatpush.msra.mxu3 %v83_v4  ;;  %v79_v8 = vld [vmem:[%s1544_s1 + $0x1c8] sm:$0xff] }
   0x3   :  { %v78_v2 = vld [vmem:[%s1544_s1 + $0x1c0] sm:$0xff]  ;;  %275 = vmatpush.msra.mxu2 %v210_v1  ;;  %v75_v12 = vld [vmem:[%s1544_s1 + $0x1a8] sm:$0xff] }
   0x4   :  { %v206_v3 = vld [vmem:[%s1544_s1 + $0x5c0] sm:$0xff]  ;;  %230 = vmatpush.msra.mxu0 %v78_v2  ;;  %322 = vmatpush.msra.mxu3 %v79_v8  ;;  %v71_v14 = vld [vmem:[%s1544_s1 + $0x188] sm:$0xff]  ;;  %v84_v2 = vld [vmem:[%s1544_s1 + $0x1f0] sm:$0xff] }
   0x5   :  { %v74_v5 = vld [vmem:[%s1544_s1 + $0x1a0] sm:$0xff]  ;;  %276 = vmatpush.msra.mxu2 %v206_v3  ;;  %v67_v18 = vld [vmem:[%s1544_s1 + $0x168] sm:$0xff] }
   0x6   :  { %v146_v6 = vld [vmem:[%s1544_s1 + $0x3e0] sm:$0xff]  ;;  %231 = vmatpush.msra.mxu0 %v74_v5  ;;  %323 = vmatpush.msra.mxu3 %v75_v12  ;;  %v63_v22 = vld [vmem:[%s1544_s1 + $0x148] sm:$0xff] }
   0x7   :  { %v202_v7 = vld [vmem:[%s1544_s1 + $0x5a0] sm:$0xff]  ;;  %252 = vmatpush.msra.mxu1 %v146_v6  ;;  %v59_v26 = vld [vmem:[%s1544_s1 + $0x128] sm:$0xff] }
   0x8   :  { %v142_v9 = vld [vmem:[%s1544_s1 + $0x3c0] sm:$0xff]  ;;  %277 = vmatpush.msra.mxu2 %v202_v7  ;;  %324 = vmatpush.msra.mxu3 %v71_v14  ;;  %v55_v30 = vld [vmem:[%s1544_s1 + $0x108] sm:$0xff]  ;;  %v80_v7 = vld [vmem:[%s1544_s1 + $0x1d0] sm:$0xff] }
   0x9   :  { %v70_v10 = vld [vmem:[%s1544_s1 + $0x180] sm:$0xff]  ;;  %253 = vmatpush.msra.mxu1 %v142_v9  ;;  %v51_v34 = vld [vmem:[%s1544_s1 + $0xe8] sm:$0xff] }
   0xa   :  { %v198_v11 = vld [vmem:[%s1544_s1 + $0x580] sm:$0xff]  ;;  %232 = vmatpush.msra.mxu0 %v70_v10  ;;  %325 = vmatpush.msra.mxu3 %v67_v18  ;;  %v47_v38 = vld [vmem:[%s1544_s1 + $0xc8] sm:$0xff] }
   0xb   :  { %v138_v13 = vld [vmem:[%s1544_s1 + $0x3a0] sm:$0xff]  ;;  %278 = vmatpush.msra.mxu2 %v198_v11  ;;  %v43_v42 = vld [vmem:[%s1544_s1 + $0xa8] sm:$0xff]  ;;  %v76_v11 = vld [vmem:[%s1544_s1 + $0x1b0] sm:$0xff] }
   0xc   :  { %v66_v15 = vld [vmem:[%s1544_s1 + $0x160] sm:$0xff]  ;;  %254 = vmatpush.msra.mxu1 %v138_v13  ;;  %326 = vmatpush.msra.mxu3 %v63_v22  ;;  %v39_v46 = vld [vmem:[%s1544_s1 + $0x88] sm:$0xff]  ;;  %v978_v13 = vld [vmem:[%s1545_s0 + $0x30] sm:$0xff] }
   0xd   :  { %v194_v16 = vld [vmem:[%s1544_s1 + $0x560] sm:$0xff]  ;;  %233 = vmatpush.msra.mxu0 %v66_v15  ;;  %v35_v50 = vld [vmem:[%s1544_s1 + $0x68] sm:$0xff]  ;;  %v72_v15 = vld [vmem:[%s1544_s1 + $0x190] sm:$0xff] }
   0xe   :  { %v134_v17 = vld [vmem:[%s1544_s1 + $0x380] sm:$0xff]  ;;  %279 = vmatpush.msra.mxu2 %v194_v16  ;;  %327 = vmatpush.msra.mxu3 %v59_v26  ;;  %v31_v54 = vld [vmem:[%s1544_s1 + $0x48] sm:$0xff] }
   0xf   :  { %v62_v19 = vld [vmem:[%s1544_s1 + $0x140] sm:$0xff]  ;;  %255 = vmatpush.msra.mxu1 %v134_v17  ;;  %v27_v58 = vld [vmem:[%s1544_s1 + $0x28] sm:$0xff] }
  0x10   :  { %v190_v20 = vld [vmem:[%s1544_s1 + $0x540] sm:$0xff]  ;;  %234 = vmatpush.msra.mxu0 %v62_v19  ;;  %328 = vmatpush.msra.mxu3 %v55_v30  ;;  %v147_v62 = vld [vmem:[%s1544_s1 + $0x3e8] sm:$0xff]  ;;  %v68_v19 = vld [vmem:[%s1544_s1 + $0x170] sm:$0xff] }
  0x11   :  { %v130_v21 = vld [vmem:[%s1544_s1 + $0x360] sm:$0xff]  ;;  %280 = vmatpush.msra.mxu2 %v190_v20  ;;  %v23_v0 = vld [vmem:[%s1544_s1 + $0x8] sm:$0xff] }
  0x12   :  { %v58_v23 = vld [vmem:[%s1544_s1 + $0x120] sm:$0xff]  ;;  %256 = vmatpush.msra.mxu1 %v130_v21  ;;  %329 = vmatpush.msra.mxu3 %v51_v34  ;;  %v143_v1 = vld [vmem:[%s1544_s1 + $0x3c8] sm:$0xff]  ;;  %v148_v34 = vld [vmem:[%s1544_s1 + $0x3f0] sm:$0xff] }
  0x13   :  { %v186_v24 = vld [vmem:[%s1544_s1 + $0x520] sm:$0xff]  ;;  %235 = vmatpush.msra.mxu0 %v58_v23  ;;  %v950_v5 = vld [vmem:[%s1545_s0 + $0x8] sm:$0xff] }
  0x14   :  { %v126_v25 = vld [vmem:[%s1544_s1 + $0x340] sm:$0xff]  ;;  %281 = vmatpush.msra.mxu2 %v186_v24  ;;  %330 = vmatpush.msra.mxu3 %v47_v38  ;;  %v139_v6 = vld [vmem:[%s1544_s1 + $0x3a8] sm:$0xff]  ;;  %v64_v24 = vld [vmem:[%s1544_s1 + $0x150] sm:$0xff] }
  0x15   :  { %v54_v27 = vld [vmem:[%s1544_s1 + $0x100] sm:$0xff]  ;;  %257 = vmatpush.msra.mxu1 %v126_v25  ;;  %v211_v8 = vld [vmem:[%s1544_s1 + $0x5e8] sm:$0xff]  ;;  %v144_v38 = vld [vmem:[%s1544_s1 + $0x3d0] sm:$0xff] }
  0x16   :  { %v182_v28 = vld [vmem:[%s1544_s1 + $0x500] sm:$0xff]  ;;  %236 = vmatpush.msra.mxu0 %v54_v27  ;;  %331 = vmatpush.msra.mxu3 %v43_v42  ;;  %v135_v9 = vld [vmem:[%s1544_s1 + $0x388] sm:$0xff]  ;;  %v140_v42 = vld [vmem:[%s1544_s1 + $0x3b0] sm:$0xff] }
  0x17   :  { %v122_v29 = vld [vmem:[%s1544_s1 + $0x320] sm:$0xff]  ;;  %282 = vmatpush.msra.mxu2 %v182_v28  ;;  %v207_v12 = vld [vmem:[%s1544_s1 + $0x5c8] sm:$0xff]  ;;  %v60_v28 = vld [vmem:[%s1544_s1 + $0x130] sm:$0xff] }
  0x18   :  { %v50_v31 = vld [vmem:[%s1544_s1 + $0xe0] sm:$0xff]  ;;  %258 = vmatpush.msra.mxu1 %v122_v29  ;;  %332 = vmatpush.msra.mxu3 %v39_v46  ;;  %v131_v14 = vld [vmem:[%s1544_s1 + $0x368] sm:$0xff]  ;;  %v136_v46 = vld [vmem:[%s1544_s1 + $0x390] sm:$0xff] }
  0x19   :  { %v178_v32 = vld [vmem:[%s1544_s1 + $0x4e0] sm:$0xff]  ;;  %237 = vmatpush.msra.mxu0 %v50_v31  ;;  %v203_v16 = vld [vmem:[%s1544_s1 + $0x5a8] sm:$0xff]  ;;  %v1041_v31 = vld [vmem:[%s1545_s0 + $0x18] sm:$0xff] }
  0x1a   :  { %v118_v33 = vld [vmem:[%s1544_s1 + $0x300] sm:$0xff]  ;;  %283 = vmatpush.msra.mxu2 %v178_v32  ;;  %333 = vmatpush.msra.mxu3 %v35_v50  ;;  %v127_v17 = vld [vmem:[%s1544_s1 + $0x348] sm:$0xff]  ;;  %v40_v50 = vld [vmem:[%s1544_s1 + $0x90] sm:$0xff] }
  0x1b   :  { %v46_v35 = vld [vmem:[%s1544_s1 + $0xc0] sm:$0xff]  ;;  %259 = vmatpush.msra.mxu1 %v118_v33  ;;  %v199_v20 = vld [vmem:[%s1544_s1 + $0x588] sm:$0xff]  ;;  %v56_v33 = vld [vmem:[%s1544_s1 + $0x110] sm:$0xff] }
  0x1c   :  { %v174_v36 = vld [vmem:[%s1544_s1 + $0x4c0] sm:$0xff]  ;;  %238 = vmatpush.msra.mxu0 %v46_v35  ;;  %334 = vmatpush.msra.mxu3 %v31_v54  ;;  %v1010_v22 = vld [vmem:[%s1545_s0 + $0x28] sm:$0xff]  ;;  %v36_v54 = vld [vmem:[%s1544_s1 + $0x70] sm:$0xff] }
  0x1d   :  { %v114_v37 = vld [vmem:[%s1544_s1 + $0x2e0] sm:$0xff]  ;;  %284 = vmatpush.msra.mxu2 %v174_v36  ;;  %v123_v23 = vld [vmem:[%s1544_s1 + $0x328] sm:$0xff] }
  0x1e   :  { %v42_v39 = vld [vmem:[%s1544_s1 + $0xa0] sm:$0xff]  ;;  %260 = vmatpush.msra.mxu1 %v114_v37  ;;  %335 = vmatpush.msra.mxu3 %v27_v58  ;;  %v195_v25 = vld [vmem:[%s1544_s1 + $0x568] sm:$0xff]  ;;  %v52_v37 = vld [vmem:[%s1544_s1 + $0xf0] sm:$0xff] }
  0x1f   :  { %v170_v40 = vld [vmem:[%s1544_s1 + $0x4a0] sm:$0xff]  ;;  %239 = vmatpush.msra.mxu0 %v42_v39  ;;  %v219_v26 = vld [vmem:[%s1544_s1 + $0x628] sm:$0xff]  ;;  %v32_v58 = vld [vmem:[%s1544_s1 + $0x50] sm:$0xff] }
  0x20   :  { %v110_v41 = vld [vmem:[%s1544_s1 + $0x2c0] sm:$0xff]  ;;  %285 = vmatpush.msra.mxu2 %v170_v40  ;;  %336 = vmatpush.msra.mxu3 %v23_v0  ;;  %v119_v27 = vld [vmem:[%s1544_s1 + $0x308] sm:$0xff]  ;;  %v120_v0 = vld [vmem:[%s1544_s1 + $0x310] sm:$0xff] }
  0x21   :  { %v38_v43 = vld [vmem:[%s1544_s1 + $0x80] sm:$0xff]  ;;  %261 = vmatpush.msra.mxu1 %v110_v41  ;;  %v191_v29 = vld [vmem:[%s1544_s1 + $0x548] sm:$0xff]  ;;  %v48_v41 = vld [vmem:[%s1544_s1 + $0xd0] sm:$0xff] }
  0x22   :  { %v166_v44 = vld [vmem:[%s1544_s1 + $0x480] sm:$0xff]  ;;  %240 = vmatpush.msra.mxu0 %v38_v43  ;;  %413 = vmatpush.msrb.mxu3 %v84_v2  ;;  %v215_v30 = vld [vmem:[%s1544_s1 + $0x608] sm:$0xff]  ;;  %v212_v2 = vld [vmem:[%s1544_s1 + $0x5f0] sm:$0xff] }
  0x23   :  { %v106_v45 = vld [vmem:[%s1544_s1 + $0x2a0] sm:$0xff]  ;;  %286 = vmatpush.msra.mxu2 %v166_v44  ;;  %v115_v32 = vld [vmem:[%s1544_s1 + $0x2e8] sm:$0xff] }
  0x24   :  { %v34_v47 = vld [vmem:[%s1544_s1 + $0x60] sm:$0xff]  ;;  %262 = vmatpush.msra.mxu1 %v106_v45  ;;  %414 = vmatpush.msrb.mxu3 %v80_v7  ;;  %v187_v35 = vld [vmem:[%s1544_s1 + $0x528] sm:$0xff]  ;;  %v44_v45 = vld [vmem:[%s1544_s1 + $0xb0] sm:$0xff] }
  0x25   :  { %v162_v48 = vld [vmem:[%s1544_s1 + $0x460] sm:$0xff]  ;;  %241 = vmatpush.msra.mxu0 %v34_v47  ;;  %v111_v36 = vld [vmem:[%s1544_s1 + $0x2c8] sm:$0xff] }
  0x26   :  { %v102_v49 = vld [vmem:[%s1544_s1 + $0x280] sm:$0xff]  ;;  %287 = vmatpush.msra.mxu2 %v162_v48  ;;  %415 = vmatpush.msrb.mxu3 %v76_v11  ;;  %v183_v39 = vld [vmem:[%s1544_s1 + $0x508] sm:$0xff]  ;;  %v1096_v48 = vld [vmem:[%s1545_s0 + $0x38] sm:$0xff] }
  0x27   :  { %v30_v51 = vld [vmem:[%s1544_s1 + $0x40] sm:$0xff]  ;;  %263 = vmatpush.msra.mxu1 %v102_v49  ;;  %v107_v40 = vld [vmem:[%s1544_s1 + $0x2a8] sm:$0xff] }
  0x28   :  { %v158_v52 = vld [vmem:[%s1544_s1 + $0x440] sm:$0xff]  ;;  %242 = vmatpush.msra.mxu0 %v30_v51  ;;  %416 = vmatpush.msrb.mxu3 %v72_v15  ;;  %v179_v43 = vld [vmem:[%s1544_s1 + $0x4e8] sm:$0xff]  ;;  %v132_v51 = vld [vmem:[%s1544_s1 + $0x370] sm:$0xff] }
  0x29   :  { %v98_v53 = vld [vmem:[%s1544_s1 + $0x260] sm:$0xff]  ;;  %288 = vmatpush.msra.mxu2 %v158_v52  ;;  %v103_v44 = vld [vmem:[%s1544_s1 + $0x288] sm:$0xff]  ;;  %v108_v15 = vld [vmem:[%s1544_s1 + $0x2b0] sm:$0xff] }
  0x2a   :  { %v26_v55 = vld [vmem:[%s1544_s1 + $0x20] sm:$0xff]  ;;  %264 = vmatpush.msra.mxu1 %v98_v53  ;;  %417 = vmatpush.msrb.mxu3 %v68_v19  ;;  %v175_v47 = vld [vmem:[%s1544_s1 + $0x4c8] sm:$0xff]  ;;  %v104_v19 = vld [vmem:[%s1544_s1 + $0x290] sm:$0xff] }
  0x2b   :  { %v154_v56 = vld [vmem:[%s1544_s1 + $0x420] sm:$0xff]  ;;  %243 = vmatpush.msra.mxu0 %v26_v55  ;;  %v99_v49 = vld [vmem:[%s1544_s1 + $0x268] sm:$0xff]  ;;  %v128_v55 = vld [vmem:[%s1544_s1 + $0x350] sm:$0xff] }
  0x2c   :  { %v94_v57 = vld [vmem:[%s1544_s1 + $0x240] sm:$0xff]  ;;  %289 = vmatpush.msra.mxu2 %v154_v56  ;;  %418 = vmatpush.msrb.mxu3 %v64_v24  ;;  %v171_v52 = vld [vmem:[%s1544_s1 + $0x4a8] sm:$0xff]  ;;  %v73_v24 = vld [vmem:[%s1544_s1 + $0x198] sm:$0xff] }
  0x2d   :  { %v22_v59 = vld [vmem:[%s1544_s1] sm:$0xff]  ;;  %265 = vmatpush.msra.mxu1 %v94_v57  ;;  %v95_v53 = vld [vmem:[%s1544_s1 + $0x248] sm:$0xff] }
  0x2e   :  { %v150_v60 = vld [vmem:[%s1544_s1 + $0x400] sm:$0xff]  ;;  %244 = vmatpush.msra.mxu0 %v22_v59  ;;  %419 = vmatpush.msrb.mxu3 %v60_v28  ;;  %v167_v56 = vld [vmem:[%s1544_s1 + $0x488] sm:$0xff]  ;;  %v124_v59 = vld [vmem:[%s1544_s1 + $0x330] sm:$0xff] }
  0x2f   :  { %v90_v63 = vld [vmem:[%s1544_s1 + $0x220] sm:$0xff]  ;;  %290 = vmatpush.msra.mxu2 %v150_v60  ;;  %v91_v57 = vld [vmem:[%s1544_s1 + $0x228] sm:$0xff]  ;;  %v69_v28 = vld [vmem:[%s1544_s1 + $0x178] sm:$0xff] }
  0x30   :  { %291 = vmatmul.f32.vlgmr.msra.gmra.mxu2 %v921_v61  ;;  %344 = vmatpush.msrb.mxu0 %v147_v62  ;;  %v86_v3 = vld [vmem:[%s1544_s1 + $0x200] sm:$0xff]  ;;  %v163_v60 = vld [vmem:[%s1544_s1 + $0x468] sm:$0xff] }
  0x31   :  { %v945_v4 = vld [vmem:[%s1545_s0] sm:$0xff]  ;;  %266 = vmatpush.msra.mxu1 %v90_v63  ;;  %420 = vmatpush.msrb.mxu3 %v56_v33  ;;  %v87_v62 = vld [vmem:[%s1544_s1 + $0x208] sm:$0xff]  ;;  %v28_v63 = vld [vmem:[%s1544_s1 + $0x30] sm:$0xff] }
  0x32   :  { %345 = vmatpush.msrb.mxu0 %v143_v1  ;;  %v218_v10 = vld [vmem:[%s1544_s1 + $0x620] sm:$0xff]  ;;  %v159_v1 = vld [vmem:[%s1544_s1 + $0x448] sm:$0xff]  ;;  %337 = vmatmul.f32.vlgmr.msra.gmra.mxu3 %v945_v4  ;;  %v65_v33 = vld [vmem:[%s1544_s1 + $0x158] sm:$0xff] }
  0x33   :  { %267 = vmatpush.msra.mxu1 %v86_v3  ;;  %245 = vmatmul.f32.vlgmr.msra.gmra.mxu0 %v945_v4  ;;  %v214_v18 = vld [vmem:[%s1544_s1 + $0x600] sm:$0xff]  ;;  %v24_v3 = vld [vmem:[%s1544_s1 + $0x10] sm:$0xff]  ;;  %v155_v7 = vld [vmem:[%s1544_s1 + $0x428] sm:$0xff] }
  0x34   :  { %268 = vmatmul.f32.vlgmr.msra.gmra.mxu1 %v950_v5  ;;  %346 = vmatpush.msrb.mxu0 %v139_v6  ;;  %v1005_v21 = vld [vmem:[%s1545_s0 + $0x20] sm:$0xff]  ;;  %v116_v6 = vld [vmem:[%s1544_s1 + $0x2f0] sm:$0xff]  ;;  %v151_v11 = vld [vmem:[%s1544_s1 + $0x408] sm:$0xff] }
  0x35   :  { %367 = vmatpush.msrb.mxu1 %v211_v8  ;;  %312 = vmatpush.msrb.mxu2 %v218_v10  ;;  %v208_v8 = vld [vmem:[%s1544_s1 + $0x5d0] sm:$0xff] }
  0x36   :  { %347 = vmatpush.msrb.mxu0 %v135_v9  ;;  %421 = vmatpush.msrb.mxu3 %v52_v37  ;;  %v85_v9 = vld [vmem:[%s1544_s1 + $0x1f8] sm:$0xff]  ;;  %v112_v10 = vld [vmem:[%s1544_s1 + $0x2d0] sm:$0xff] }
  0x37   :  { %368 = vmatpush.msrb.mxu1 %v207_v12  ;;  %313 = vmatpush.msrb.mxu2 %v214_v18  ;;  %v204_v12 = vld [vmem:[%s1544_s1 + $0x5b0] sm:$0xff]  ;;  %v77_v18 = vld [vmem:[%s1544_s1 + $0x1b8] sm:$0xff] }
  0x38   :  { %294 = vmatmul.f32.gmra.mxu2 %v978_v13  ;;  %348 = vmatpush.msrb.mxu0 %v131_v14  ;;  %v81_v14 = vld [vmem:[%s1544_s1 + $0x1d8] sm:$0xff] }
  0x39   :  { %369 = vmatpush.msrb.mxu1 %v203_v16  ;;  %404 = vmatpush.msra.mxu2 %v219_v26  ;;  %v220_v16 = vld [vmem:[%s1544_s1 + $0x630] sm:$0xff]  ;;  %v61_v37 = vld [vmem:[%s1544_s1 + $0x138] sm:$0xff] }
  0x3a   :  { %349 = vmatpush.msrb.mxu0 %v127_v17  ;;  %422 = vmatpush.msrb.mxu3 %v48_v41  ;;  %v200_v17 = vld [vmem:[%s1544_s1 + $0x590] sm:$0xff]  ;;  %v57_v41 = vld [vmem:[%s1544_s1 + $0x118] sm:$0xff] }
  0x3b   :  { %370 = vmatpush.msrb.mxu1 %v199_v20  ;;  %248 = vmatmul.f32.gmra.mxu0 %v1005_v21  ;;  %v216_v20 = vld [vmem:[%s1544_s1 + $0x610] sm:$0xff] }
  0x3c   :  { %271 = vmatmul.f32.gmra.mxu1 %v1010_v22  ;;  %350 = vmatpush.msrb.mxu0 %v123_v23  ;;  %v196_v23 = vld [vmem:[%s1544_s1 + $0x570] sm:$0xff] }
  0x3d   :  { %371 = vmatpush.msrb.mxu1 %v195_v25  ;;  %405 = vmatpush.msra.mxu2 %v215_v30  ;;  %v149_v25 = vld [vmem:[%s1544_s1 + $0x3f8] sm:$0xff]  ;;  %v100_v26 = vld [vmem:[%s1544_s1 + $0x270] sm:$0xff] }
  0x3e   :  { %351 = vmatpush.msrb.mxu0 %v119_v27  ;;  %423 = vmatpush.msrb.mxu3 %v44_v45  ;;  %v192_v27 = vld [vmem:[%s1544_s1 + $0x550] sm:$0xff]  ;;  %v53_v45 = vld [vmem:[%s1544_s1 + $0xf8] sm:$0xff] }
  0x3f   :  { %372 = vmatpush.msrb.mxu1 %v191_v29  ;;  %340 = vmatmul.f32.gmra.mxu3 %v1005_v21  ;;  %v145_v29 = vld [vmem:[%s1544_s1 + $0x3d8] sm:$0xff]  ;;  %v188_v30 = vld [vmem:[%s1544_s1 + $0x530] sm:$0xff] }
  0x40   :  { %703 = vmatmul.msk.f32.vlgmr.msrb.gmra.mxu2 %vm222_vm0, %v1041_v31  ;;  %352 = vmatpush.msrb.mxu0 %v115_v32  ;;  %v96_v32 = vld [vmem:[%s1544_s1 + $0x250] sm:$0xff] }
  0x41   :  { %436 = vmatpush.msrb.mxu2 %v148_v34  ;;  %373 = vmatpush.msrb.mxu1 %v187_v35  ;;  %v141_v34 = vld [vmem:[%s1544_s1 + $0x3b8] sm:$0xff]  ;;  %v92_v35 = vld [vmem:[%s1544_s1 + $0x230] sm:$0xff] }
  0x42   :  { %353 = vmatpush.msrb.mxu0 %v111_v36  ;;  %424 = vmatpush.msrb.mxu3 %v40_v50  ;;  %v184_v36 = vld [vmem:[%s1544_s1 + $0x510] sm:$0xff]  ;;  %v49_v50 = vld [vmem:[%s1544_s1 + $0xd8] sm:$0xff] }
  0x43   :  { %437 = vmatpush.msrb.mxu2 %v144_v38  ;;  %374 = vmatpush.msrb.mxu1 %v183_v39  ;;  %v137_v38 = vld [vmem:[%s1544_s1 + $0x398] sm:$0xff]  ;;  %v88_v39 = vld [vmem:[%s1544_s1 + $0x210] sm:$0xff] }
  0x44   :  { %354 = vmatpush.msrb.mxu0 %v107_v40  ;;  %425 = vmatpush.msrb.mxu3 %v36_v54  ;;  %v180_v40 = vld [vmem:[%s1544_s1 + $0x4f0] sm:$0xff]  ;;  %v45_v54 = vld [vmem:[%s1544_s1 + $0xb8] sm:$0xff] }
  0x45   :  { %438 = vmatpush.msrb.mxu2 %v140_v42  ;;  %375 = vmatpush.msrb.mxu1 %v179_v43  ;;  %v133_v42 = vld [vmem:[%s1544_s1 + $0x378] sm:$0xff] }
  0x46   :  { %355 = vmatpush.msrb.mxu0 %v103_v44  ;;  %426 = vmatpush.msrb.mxu3 %v32_v58  ;;  %v213_v43 = vld [vmem:[%s1544_s1 + $0x5f8] sm:$0xff]  ;;  %v176_v44 = vld [vmem:[%s1544_s1 + $0x4d0] sm:$0xff] }
  0x47   :  { %439 = vmatpush.msrb.mxu2 %v136_v46  ;;  %376 = vmatpush.msrb.mxu1 %v175_v47  ;;  %v129_v46 = vld [vmem:[%s1544_s1 + $0x358] sm:$0xff] }
  0x48   :  { %704 = vmatmul.msk.f32.gmra.mxu2 %vm222_vm0, %v1096_v48  ;;  %356 = vmatpush.msrb.mxu0 %v99_v49  ;;  %v209_v47 = vld [vmem:[%s1544_s1 + $0x5d8] sm:$0xff]  ;;  %v172_v49 = vld [vmem:[%s1544_s1 + $0x4b0] sm:$0xff] }
  0x49   :  { %440 = vmatpush.msrb.mxu2 %v132_v51  ;;  %377 = vmatpush.msrb.mxu1 %v171_v52  ;;  %v125_v51 = vld [vmem:[%s1544_s1 + $0x338] sm:$0xff] }
  0x4a   :  { %357 = vmatpush.msrb.mxu0 %v95_v53  ;;  %427 = vmatpush.msrb.mxu3 %v28_v63  ;;  %v205_v52 = vld [vmem:[%s1544_s1 + $0x5b8] sm:$0xff]  ;;  %v168_v53 = vld [vmem:[%s1544_s1 + $0x490] sm:$0xff] }
  0x4b   :  { %441 = vmatpush.msrb.mxu2 %v128_v55  ;;  %378 = vmatpush.msrb.mxu1 %v167_v56  ;;  %v121_v55 = vld [vmem:[%s1544_s1 + $0x318] sm:$0xff] }
  0x4c   :  { %358 = vmatpush.msrb.mxu0 %v91_v57  ;;  %428 = vmatpush.msrb.mxu3 %v24_v3  ;;  %v201_v56 = vld [vmem:[%s1544_s1 + $0x598] sm:$0xff]  ;;  %v164_v57 = vld [vmem:[%s1544_s1 + $0x470] sm:$0xff] }
  0x4d   :  { %442 = vmatpush.msrb.mxu2 %v124_v59  ;;  %379 = vmatpush.msrb.mxu1 %v163_v60  ;;  %v41_v58 = vld [vmem:[%s1544_s1 + $0x98] sm:$0xff] }
  0x4e   :  { %359 = vmatpush.msrb.mxu0 %v87_v62  ;;  %505 = vmatpush.msra.mxu3 %v85_v9  ;;  %v117_v59 = vld [vmem:[%s1544_s1 + $0x2f8] sm:$0xff]  ;;  %v160_v62 = vld [vmem:[%s1544_s1 + $0x450] sm:$0xff] }
  0x4f   :  { %443 = vmatpush.msrb.mxu2 %v120_v0  ;;  %380 = vmatpush.msrb.mxu1 %v159_v1  ;;  %v197_v60 = vld [vmem:[%s1544_s1 + $0x578] sm:$0xff] }
  0x50   :  { %459 = vmatpush.msra.mxu0 %v212_v2  ;;  %705 = vmatmul.msk.f32.vlgmr.msra.gmra.mxu2 %vm222_vm0, %v1041_v31  ;;  %v37_v63 = vld [vmem:[%s1544_s1 + $0x78] sm:$0xff]  ;;  %v156_v2 = vld [vmem:[%s1544_s1 + $0x430] sm:$0xff] }
  0x51   :  { %444 = vmatpush.msrb.mxu2 %v116_v6  ;;  %381 = vmatpush.msrb.mxu1 %v155_v7  ;;  %v113_v0 = vld [vmem:[%s1544_s1 + $0x2d8] sm:$0xff] }
  0x52   :  { %460 = vmatpush.msra.mxu0 %v208_v8  ;;  %506 = vmatpush.msra.mxu3 %v81_v14  ;;  %v193_v1 = vld [vmem:[%s1544_s1 + $0x558] sm:$0xff]  ;;  %v152_v8 = vld [vmem:[%s1544_s1 + $0x410] sm:$0xff] }
  0x53   :  { %445 = vmatpush.msrb.mxu2 %v112_v10  ;;  %382 = vmatpush.msrb.mxu1 %v151_v11  ;;  %v33_v3 = vld [vmem:[%s1544_s1 + $0x58] sm:$0xff] }
  0x54   :  { %461 = vmatpush.msra.mxu0 %v204_v12  ;;  %507 = vmatpush.msra.mxu3 %v77_v18  ;;  %v109_v6 = vld [vmem:[%s1544_s1 + $0x2b8] sm:$0xff] }
  0x55   :  { %360 = vmatmul.f32.vlgmr.msrb.gmra.mxu0 %v950_v5  ;;  %446 = vmatpush.msrb.mxu2 %v108_v15  ;;  %v189_v7 = vld [vmem:[%s1544_s1 + $0x538] sm:$0xff] }
  0x56   :  { %496 = vmatpush.msra.mxu1 %v220_v16  ;;  %462 = vmatpush.msra.mxu0 %v200_v17  ;;  %v29_v9 = vld [vmem:[%s1544_s1 + $0x38] sm:$0xff] }
  0x57   :  { %383 = vmatmul.f32.vlgmr.msrb.gmra.mxu1 %v921_v61  ;;  %447 = vmatpush.msrb.mxu2 %v104_v19  ;;  %v105_v10 = vld [vmem:[%s1544_s1 + $0x298] sm:$0xff] }
  0x58   :  { %497 = vmatpush.msra.mxu1 %v216_v20  ;;  %463 = vmatpush.msra.mxu0 %v196_v23  ;;  %v185_v11 = vld [vmem:[%s1544_s1 + $0x518] sm:$0xff] }
  0x59   :  { %508 = vmatpush.msra.mxu3 %v73_v24  ;;  %448 = vmatpush.msrb.mxu2 %v100_v26  ;;  %v25_v12 = vld [vmem:[%s1544_s1 + $0x18] sm:$0xff] }
  0x5a   :  { %528 = vmatpush.msrb.mxu1 %v149_v25  ;;  %464 = vmatpush.msra.mxu0 %v192_v27  ;;  %v101_v14 = vld [vmem:[%s1544_s1 + $0x278] sm:$0xff] }
  0x5b   :  { %509 = vmatpush.msra.mxu3 %v69_v28  ;;  %706 = vmatmul.msk.f32.gmra.mxu2 %vm222_vm0, %v1096_v48  ;;  %v181_v15 = vld [vmem:[%s1544_s1 + $0x4f8] sm:$0xff] }
  0x5c   :  { %529 = vmatpush.msrb.mxu1 %v145_v29  ;;  %465 = vmatpush.msra.mxu0 %v188_v30  ;;  %v97_v16 = vld [vmem:[%s1544_s1 + $0x258] sm:$0xff]  ;;  %v619_v30 = vld [vmem:[%s1546_s2 + $0x50] sm:$0xff] }
  0x5d   :  { %449 = vmatpush.msrb.mxu2 %v96_v32  ;;  %510 = vmatpush.msra.mxu3 %v65_v33  ;;  %v177_v17 = vld [vmem:[%s1544_s1 + $0x4d8] sm:$0xff]  ;;  %v618_v32 = vld [vmem:[%s1546_s2 + $0x48] sm:$0xff]  ;;  %v617_v33 = vld [vmem:[%s1546_s2 + $0x40] sm:$0xff] }
  0x5e   :  { %530 = vmatpush.msrb.mxu1 %v141_v34  ;;  %363 = vmatmul.f32.gmra.mxu0 %v1010_v22  ;;  %v93_v18 = vld [vmem:[%s1544_s1 + $0x238] sm:$0xff] }
  0x5f   :  { %450 = vmatpush.msrb.mxu2 %v92_v35  ;;  %466 = vmatpush.msra.mxu0 %v184_v36  ;;  %v173_v19 = vld [vmem:[%s1544_s1 + $0x4b8] sm:$0xff]  ;;  %v615_v36 = vld [vmem:[%s1546_s2 + $0x30] sm:$0xff] }
  0x60   :  { %511 = vmatpush.msra.mxu3 %v61_v37  ;;  %531 = vmatpush.msrb.mxu1 %v137_v38  ;;  %v89_v20 = vld [vmem:[%s1544_s1 + $0x218] sm:$0xff] }
  0x61   :  { %386 = vmatmul.f32.gmra.mxu1 %v978_v13  ;;  %451 = vmatpush.msrb.mxu2 %v88_v39  ;;  %v169_v23 = vld [vmem:[%s1544_s1 + $0x498] sm:$0xff]  ;;  %v614_v39 = vld [vmem:[%s1546_s2 + $0x28] sm:$0xff] }
  0x62   :  { %467 = vmatpush.msra.mxu0 %v180_v40  ;;  %512 = vmatpush.msra.mxu3 %v57_v41  ;;  %v165_v24 = vld [vmem:[%s1544_s1 + $0x478] sm:$0xff]  ;;  %v613_v40 = vld [vmem:[%s1546_s2 + $0x20] sm:$0xff] }
  0x63   :  { %532 = vmatpush.msrb.mxu1 %v133_v42  ;;  %551 = vmatpush.msra.mxu2 %v213_v43  ;;  %v161_v25 = vld [vmem:[%s1544_s1 + $0x458] sm:$0xff]  ;;  %v639_v43 = vld [vmem:[%s1546_s2 + $0xf0] sm:$0xff] }
  0x64   :  { %429 = vmatmul.f32.vlgmr.msrb.gmra.mxu3 %v945_v4  ;;  %468 = vmatpush.msra.mxu0 %v176_v44  ;;  %v217_v26 = vld [vmem:[%s1544_s1 + $0x618] sm:$0xff] }
  0x65   :  { %513 = vmatpush.msra.mxu3 %v53_v45  ;;  %533 = vmatpush.msrb.mxu1 %v129_v46  ;;  %v157_v27 = vld [vmem:[%s1544_s1 + $0x438] sm:$0xff]  ;;  %v611_v46 = vld [vmem:[%s1546_s2 + $0x10] sm:$0xff] }
  0x66   :  { %552 = vmatpush.msra.mxu2 %v209_v47  ;;  %469 = vmatpush.msra.mxu0 %v172_v49  ;;  %v624_v28 = vld [vmem:[%s1546_s2 + $0x78] sm:$0xff]  ;;  %v638_v47 = vld [vmem:[%s1546_s2 + $0xe8] sm:$0xff] }
  0x67   :  { %514 = vmatpush.msra.mxu3 %v49_v50  ;;  %534 = vmatpush.msrb.mxu1 %v125_v51  ;;  %v620_v29 = vld [vmem:[%s1546_s2 + $0x58] sm:$0xff]  ;;  %v610_v50 = vld [vmem:[%s1546_s2 + $0x8] sm:$0xff]  ;;  %v637_v51 = vld [vmem:[%s1546_s2 + $0xe0] sm:$0xff] }
  0x68   :  { %553 = vmatpush.msra.mxu2 %v205_v52  ;;  %470 = vmatpush.msra.mxu0 %v168_v53  ;;  %v616_v34 = vld [vmem:[%s1546_s2 + $0x38] sm:$0xff]  ;;  %v609_v52 = vld [vmem:[%s1546_s2] sm:$0xff] }
  0x69   :  { %515 = vmatpush.msra.mxu3 %v45_v54  ;;  %535 = vmatpush.msrb.mxu1 %v121_v55  ;;  %v640_v41 = vld [vmem:[%s1546_s2 + $0xf8] sm:$0xff] }
  0x6a   :  { %554 = vmatpush.msra.mxu2 %v201_v56  ;;  %707 = vmatmul.msk.f32.vlgmr.msra.gmra.mxu1 %vm222_vm0, %v1041_v31  ;;  %v612_v42 = vld [vmem:[%s1546_s2 + $0x18] sm:$0xff]  ;;  %v635_v56 = vld [vmem:[%s1546_s2 + $0xd0] sm:$0xff] }
  0x6b   :  { %452 = vmatmul.f32.vlgmr.msrb.gmra.mxu2 %v950_v5  ;;  %471 = vmatpush.msra.mxu0 %v164_v57  ;;  %v636_v53 = vld [vmem:[%s1546_s2 + $0xd8] sm:$0xff] }
  0x6c   :  { %516 = vmatpush.msra.mxu3 %v41_v58  ;;  %536 = vmatpush.msrb.mxu1 %v117_v59  ;;  %v634_v58 = vld [vmem:[%s1546_s2 + $0xc8] sm:$0xff] }
  0x6d   :  { %555 = vmatpush.msra.mxu2 %v197_v60  ;;  %432 = vmatmul.f32.gmra.mxu3 %v1005_v21  ;;  %v633_v60 = vld [vmem:[%s1546_s2 + $0xc0] sm:$0xff] }
  0x6e   :  { %472 = vmatpush.msra.mxu0 %v160_v62  ;;  %517 = vmatpush.msra.mxu3 %v37_v63  ;;  %v632_v62 = vld [vmem:[%s1546_s2 + $0xb8] sm:$0xff]  ;;  %v631_v63 = vld [vmem:[%s1546_s2 + $0xb0] sm:$0xff] }
  0x6f   :  { %537 = vmatpush.msrb.mxu1 %v113_v0  ;;  %556 = vmatpush.msra.mxu2 %v193_v1  ;;  %v630_v0 = vld [vmem:[%s1546_s2 + $0xa8] sm:$0xff] }
  0x70   :  { %473 = vmatpush.msra.mxu0 %v156_v2  ;;  %518 = vmatpush.msra.mxu3 %v33_v3 }
  0x71   :  { %538 = vmatpush.msrb.mxu1 %v109_v6  ;;  %557 = vmatpush.msra.mxu2 %v189_v7  ;;  %v629_v6 = vld [vmem:[%s1546_s2 + $0xa0] sm:$0xff] }
  0x72   :  { %474 = vmatpush.msra.mxu0 %v152_v8  ;;  %519 = vmatpush.msra.mxu3 %v29_v9  ;;  %v628_v8 = vld [vmem:[%s1546_s2 + $0x98] sm:$0xff] }
  0x73   :  { %539 = vmatpush.msrb.mxu1 %v105_v10  ;;  %558 = vmatpush.msra.mxu2 %v185_v11  ;;  %v627_v10 = vld [vmem:[%s1546_s2 + $0x90] sm:$0xff] }
  0x74   :  { %455 = vmatmul.f32.gmra.mxu2 %v1010_v22  ;;  %475 = vmatmul.f32.vlgmr.msra.gmra.mxu0 %v921_v61 }
  0x75   :  { %708 = vmatmul.msk.f32.gmra.mxu1 %vm222_vm0, %v1096_v48  ;;  %520 = vmatpush.msra.mxu3 %v25_v12 }
  0x76   :  { %540 = vmatpush.msrb.mxu1 %v101_v14  ;;  %559 = vmatpush.msra.mxu2 %v181_v15  ;;  %v626_v14 = vld [vmem:[%s1546_s2 + $0x88] sm:$0xff] }
  0x77   :  { %521 = vmatmul.f32.vlgmr.msra.gmra.mxu3 %v945_v4  ;;  %v221_v4 = vld [vmem:[%s1544_s1 + $0x638] sm:$0xff]  ;;  %664 = vmatpush.msrb.mxu0 %v640_v41 }
  0x78   :  { %541 = vmatpush.msrb.mxu1 %v97_v16  ;;  %560 = vmatpush.msra.mxu2 %v177_v17  ;;  %v625_v17 = vld [vmem:[%s1546_s2 + $0x80] sm:$0xff] }
  0x79   :  { %641 = vmatpush.msrb.mxu3 %v624_v28  ;;  %665 = vmatpush.msrb.mxu0 %v639_v43 }
  0x7a   :  { %542 = vmatpush.msrb.mxu1 %v93_v18  ;;  %561 = vmatpush.msra.mxu2 %v173_v19 }
  0x7b   :  { %666 = vmatpush.msrb.mxu0 %v638_v47 }
  0x7c   :  { %543 = vmatpush.msrb.mxu1 %v89_v20  ;;  %562 = vmatpush.msra.mxu2 %v169_v23 }
  0x7d   :  { %478 = vmatmul.f32.gmra.mxu0 %v978_v13  ;;  %544 = vmatmul.f32.vlgmr.msrb.gmra.mxu1 %v950_v5  ;;  %v153_v5 = vld [vmem:[%s1544_s1 + $0x418] sm:$0xff] }
  0x7e   :  { %588 = vmatpush.msra.mxu1 %v221_v4  ;;  %563 = vmatpush.msra.mxu2 %v165_v24 }
  0x7f   :  { %524 = vmatmul.f32.gmra.mxu3 %v1005_v21  ;;  %667 = vmatpush.msrb.mxu0 %v637_v51 }
  0x80   :  { %564 = vmatpush.msra.mxu2 %v161_v25  ;;  %589 = vmatpush.msra.mxu1 %v217_v26 }
  0x81   :  { %668 = vmatpush.msrb.mxu0 %v636_v53 }
  0x82   :  { %565 = vmatpush.msra.mxu2 %v157_v27 }
  0x83   :  { %669 = vmatpush.msrb.mxu0 %v635_v56 }
  0x84   :  { %566 = vmatpush.msra.mxu2 %v153_v5 }
  0x85   :  { %547 = vmatmul.f32.gmra.mxu1 %v1010_v22  ;;  %567 = vmatmul.f32.vlgmr.msra.gmra.mxu2 %v921_v61  ;;  %v623_v22 = vld [vmem:[%s1546_s2 + $0x70] sm:$0xff]  ;;  %v622_v61 = vld [vmem:[%s1546_s2 + $0x68] sm:$0xff] }
  0x86   :  { %642 = vmatpush.msrb.mxu3 %v623_v22  ;;  %670 = vmatpush.msrb.mxu0 %v634_v58 }
  0x88   :  { %643 = vmatpush.msrb.mxu3 %v622_v61  ;;  %671 = vmatpush.msrb.mxu0 %v633_v60 }
  0x8a   :  { %672 = vmatpush.msrb.mxu0 %v632_v62 }
  0x8c   :  { %673 = vmatpush.msrb.mxu0 %v631_v63 }
  0x8d   :  { %570 = vmatmul.f32.gmra.mxu2 %v978_v13  ;;  %709 = vmatmul.msk.f32.vlgmr.msra.gmra.mxu1 %vm222_vm0, %v1041_v31  ;;  %v621_v13 = vld [vmem:[%s1546_s2 + $0x60] sm:$0xff] }
  0x8e   :  { %644 = vmatpush.msrb.mxu3 %v621_v13  ;;  %674 = vmatpush.msrb.mxu0 %v630_v0 }
  0x90   :  { %645 = vmatpush.msrb.mxu3 %v620_v29  ;;  %675 = vmatpush.msrb.mxu0 %v629_v6 }
  0x92   :  { %646 = vmatpush.msrb.mxu3 %v619_v30  ;;  %676 = vmatpush.msrb.mxu0 %v628_v8 }
  0x94   :  { %647 = vmatpush.msrb.mxu3 %v618_v32  ;;  %677 = vmatpush.msrb.mxu0 %v627_v10 }
  0x95   :  { %710 = vmatmul.msk.f32.gmra.mxu1 %vm222_vm0, %v1096_v48 }
  0x96   :  { %648 = vmatpush.msrb.mxu3 %v617_v33  ;;  %678 = vmatpush.msrb.mxu0 %v626_v14 }
  0x98   :  { %649 = vmatpush.msrb.mxu3 %v616_v34  ;;  %679 = vmatpush.msrb.mxu0 %v625_v17 }
  0x9a   :  { %650 = vmatpush.msrb.mxu3 %v615_v36 }
  0x9c   :  { %651 = vmatpush.msrb.mxu3 %v614_v39 }
  0x9e   :  { %652 = vmatpush.msrb.mxu3 %v613_v40 }
  0xa0   :  { %653 = vmatpush.msrb.mxu3 %v612_v42 }
  0xa2   :  { %654 = vmatpush.msrb.mxu3 %v611_v46 }
  0xa4   :  { %655 = vmatpush.msrb.mxu3 %v610_v50 }
  0xa6   :  { %656 = vmatpush.msrb.mxu3 %v609_v52 }
  0xb0   :  { %v246_v38 = vpop.f32.mrf.mxu0 }
  0xb1   :  { %v1431_v48 = vpop.f32.mrf.mxu1 }
  0xb2   :  { %v270_v9 = vadd.f32 %v1431_v48, %v246_v38 }
  0xb3   :  { %v1415_v21 = vpop.f32.mrf.mxu2 }
  0xb4   :  { %v293_v16 = vadd.f32 %v1415_v21, %v270_v9 }
  0xb5   :  { %v338_v54 = vpop.f32.mrf.mxu3 }
  0xb8   :  { %v249_v49 = vpop.f32.mrf.mxu0 }
  0xb9   :  { %v1453_v37 = vpop.f32.mrf.mxu1 }
  0xba   :  { %v273_v24 = vadd.f32 %v1453_v37, %v249_v49 }
  0xbb   :  { %v1429_v31 = vpop.f32.mrf.mxu2 }
  0xbc   :  { %v296_v21 = vadd.f32 %v1429_v31, %v273_v24 }
  0xc2   :  { %v341_v1 = vpop.f32.mrf.mxu3 }
  0xc3   :  { %v1448_v35 = vpop.f32.mrf.mxu2 }
  0xc4   :  { %v316_v19 = vadd.f32 %v1448_v35, %v293_v16 }
  0xc6   :  { %v597_v25 = vmul.f32 %v316_v19, %v316_v19 }
  0xcb   :  { %v1470_v44 = vpop.f32.mrf.mxu2 }
  0xcc   :  { %v319_v13 = vadd.f32 %v1470_v44, %v296_v21 }
  0xce   :  { %v599_v32 = vmul.f32 %v319_v13, %v319_v13 }
  0xd2   :  { %v361_v59 = vpop.f32.mrf.mxu0 }
  0xd3   :  { %v1492_v55 = vpop.f32.mrf.mxu2  ;;  %v362_v35 = vadd.f32 %v361_v59, %v338_v54 }
  0xd4   :  { %v1472_v45 = vpop.f32.mrf.mxu1 }
  0xd5   :  { %v385_v38 = vadd.f32 %v1472_v45, %v362_v35 }
  0xd7   :  { %v408_v31 = vadd.f32 %v1492_v55, %v385_v38 }
  0xd9   :  { %v598_v47 = vmul.f32 %v408_v31, %v408_v31 }
  0xdb   :  { %v364_v7 = vpop.f32.mrf.mxu0 }
  0xdc   :  { %v365_v42 = vadd.f32 %v364_v7, %v341_v1 }
  0xde   :  { %v1497_v57 = vpop.f32.mrf.mxu1  ;;  %v410_v2 = vpop.f32.mrf.mxu2 }
  0xdf   :  { %v388_v49 = vadd.f32 %v1497_v57, %v365_v42 }
  0xe1   :  { %v411_v56 = vadd.f32 %v410_v2, %v388_v49 }
  0xe3   :  { %v600_v59 = vmul.f32 %v411_v56, %v411_v56 }
  0xe7   :  { %v499_v3 = vpop.f32.mrf.mxu1  ;;  %v430_v11 = vpop.f32.mrf.mxu3 }
  0xee   :  { %v453_v12 = vpop.f32.mrf.mxu2 }
  0xef   :  { %v454_v15 = vadd.f32 %v453_v12, %v430_v11 }
  0xf0   :  { %v433_v27 = vpop.f32.mrf.mxu3 }
  0xf1   :  { %v476_v18 = vpop.f32.mrf.mxu0 }
  0xf2   :  { %v477_v20 = vadd.f32 %v476_v18, %v454_v15  ;;  %v502_v23 = vpop.f32.mrf.mxu1 }
  0xf4   :  { %v500_v4 = vadd.f32 %v499_v3, %v477_v20 }
  0xf6   :  { %v601_v26 = vmul.f32 %v500_v4, %v500_v4 }
  0xf7   :  { %v456_v5 = vpop.f32.mrf.mxu2 }
  0xf8   :  { %v605_v28 = vadd.f32 %v601_v26, %v597_v25  ;;  %v457_v22 = vadd.f32 %v456_v5, %v433_v27 }
  0xfa   :  { %v479_v61 = vpop.f32.mrf.mxu0  ;;  %657 = vmatmul.f32.vlgmr.msrb.gmra.mxu3 %v605_v28  ;;  %v545_v29 = vpop.f32.mrf.mxu1 }
  0xfb   :  { %v480_v48 = vadd.f32 %v479_v61, %v457_v22  ;;  %v522_v36 = vpop.f32.mrf.mxu3 }
  0xfc   :  { %v546_v39 = vadd.f32 %v545_v29, %v522_v36 }
  0xfd   :  { %v503_v30 = vadd.f32 %v502_v23, %v480_v48 }
  0xff   :  { %v603_v33 = vmul.f32 %v503_v30, %v503_v30 }
 0x101   :  { %v607_v34 = vadd.f32 %v603_v33, %v599_v32 }
 0x102   :  { %v548_v37 = vpop.f32.mrf.mxu1 }
 0x103   :  { %660 = vmatmul.f32.gmra.mxu3 %v607_v34  ;;  %v525_v44 = vpop.f32.mrf.mxu3 }
 0x104   :  { %v549_v51 = vadd.f32 %v548_v37, %v525_v44 }
 0x108   :  { %v568_v40 = vpop.f32.mrf.mxu2 }
 0x109   :  { %v569_v41 = vadd.f32 %v568_v40, %v546_v39 }
 0x10a   :  { %v591_v43 = vpop.f32.mrf.mxu1 }
 0x10b   :  { %v592_v46 = vadd.f32 %v591_v43, %v569_v41 }
 0x10d   :  { %v602_v50 = vmul.f32 %v592_v46, %v592_v46 }
 0x10f   :  { %v606_v52 = vadd.f32 %v602_v50, %v598_v47 }
 0x110   :  { %v571_v53 = vpop.f32.mrf.mxu2 }
 0x111   :  { %v572_v54 = vadd.f32 %v571_v53, %v549_v51  ;;  %680 = vmatmul.f32.vlgmr.msrb.gmra.mxu0 %v606_v52 }
 0x112   :  { %v594_v45 = vpop.f32.mrf.mxu1 }
 0x113   :  { %v595_v58 = vadd.f32 %v594_v45, %v572_v54 }
 0x115   :  { %v604_v60 = vmul.f32 %v595_v58, %v595_v58 }
 0x117   :  { %v608_v62 = vadd.f32 %v604_v60, %v600_v59 }
 0x119   :  { %683 = vmatmul.f32.gmra.mxu0 %v608_v62 }
 0x17d   :  { %v658_v55 = vpop.f32.mrf.mxu3 }
 0x186   :  { %v661_v3 = vpop.f32.mrf.mxu3 }
 0x18e   :  { %v681_v63 = vpop.f32.mrf.mxu0 }
 0x18f   :  { %v682_v0 = vadd.f32 %v681_v63, %v658_v55 }
 0x191   :  { %v687_v1 = vmax.f32 %v682_v0, 1e-10 }
 0x193   :  { %711 = vlog2.f32 %v687_v1 }
 0x196   :  { %v684_v57 = vpop.f32.mrf.mxu0 }
 0x197   :  { %v685_v6 = vadd.f32 %v684_v57, %v661_v3 }
 0x199   :  { %v712_v7 = vpop.eup %711  ;;  %v688_v8 = vmax.f32 %v685_v6, 1e-10 }
 0x19a   :  { %v690_v9 = vmul.f32 0.6931472, %v712_v7 }
 0x19b   :  { %713 = vlog2.f32 %v688_v8 }
 0x19c   :  { %v693_v2 = vmul.f32 0.4342945, %v690_v9 }
 0x19e   :  { %v695_v10 = vmul.f32 10.0, %v693_v2 }
 0x1a0   :  { %697 = vst [vmem:[%s1547_s3] sm:$0xff] %v695_v10 }
 0x1a1   :  { %v714_v11 = vpop.eup %713 }
 0x1a2   :  { %v692_v12 = vmul.f32 0.6931472, %v714_v11 }
 0x1a4   :  { %v694_v14 = vmul.f32 0.4342945, %v692_v12 }
 0x1a6   :  { %v696_v15 = vmul.f32 10.0, %v694_v14 }
 0x1a8   :  { %698 = vst [vmem:[%s1547_s3 + $0x8] sm:$0xff] %v696_v15 }

// kernel: mfcc.3
= control target key start
LH: loop header
LB: loop body
LE: loop exit
PB: predicated region body
PF: predicated region fallthrough
CT: control target
= control target key end

     0   :  { %s167_s2 = inlined_call_operand.vmem [shape: f32[128,128], index: 2, kind: input, shape index: {}]   ;;  %s168_s0 = inlined_call_operand.<no memory space> [shape: f32[1,1], index: 0, kind: input, shape index: {}]   ;;  %s169_s1 = inlined_call_operand.vmem [shape: f32[16,128], index: 1, kind: input, shape index: {}]   ;;  %s170_s3 = inlined_call_operand.vmem [shape: f32[16,128], index: 3, kind: output, shape index: {}]  }
   0x1   :  { %v37_v0 = vld [vmem:[%s167_s2 + $0x78] sm:$0xff]  ;;  %v36_v1 = vld [vmem:[%s167_s2 + $0x70] sm:$0xff]  ;;  %v35_v2 = vld [vmem:[%s167_s2 + $0x68] sm:$0xff]  ;;  %s67_s11 = sadd.f32 -80.0, %s168_s0 }
   0x2   :  { %38 = vmatpush.msra.mxu0 %v37_v0  ;;  %68 = vmatpush.msra.mxu1 %v37_v0  ;;  %v34_v3 = vld [vmem:[%s167_s2 + $0x60] sm:$0xff]  ;;  %v33_v4 = vld [vmem:[%s167_s2 + $0x58] sm:$0xff]  ;;  %v32_v5 = vld [vmem:[%s167_s2 + $0x50] sm:$0xff] }
   0x3   :  { %v31_v6 = vld [vmem:[%s167_s2 + $0x48] sm:$0xff]  ;;  %v30_v7 = vld [vmem:[%s167_s2 + $0x40] sm:$0xff]  ;;  %v29_v8 = vld [vmem:[%s167_s2 + $0x38] sm:$0xff]  ;;  %v19_v15 = vstv %s67_s11 }
   0x4   :  { %39 = vmatpush.msra.mxu0 %v36_v1  ;;  %69 = vmatpush.msra.mxu1 %v36_v1  ;;  %v28_v9 = vld [vmem:[%s167_s2 + $0x30] sm:$0xff]  ;;  %v27_v10 = vld [vmem:[%s167_s2 + $0x28] sm:$0xff]  ;;  %v26_v11 = vld [vmem:[%s167_s2 + $0x20] sm:$0xff] }
   0x5   :  { %v25_v12 = vld [vmem:[%s167_s2 + $0x18] sm:$0xff]  ;;  %v24_v13 = vld [vmem:[%s167_s2 + $0x10] sm:$0xff]  ;;  %v17_v14 = vld [vmem:[%s169_s1] sm:$0xff] }
   0x6   :  { %40 = vmatpush.msra.mxu0 %v35_v2  ;;  %70 = vmatpush.msra.mxu1 %v35_v2  ;;  %v18_v16 = vld [vmem:[%s169_s1 + $0x8] sm:$0xff]  ;;  %v22_v18 = vld [vmem:[%s167_s2] sm:$0xff]  ;;  %v20_v19 = vmax.f32 %v17_v14, %v19_v15 }
   0x7   :  { %v23_v17 = vld [vmem:[%s167_s2 + $0x8] sm:$0xff]  ;;  %v21_v20 = vmax.f32 %v18_v16, %v19_v15 }
   0x8   :  { %41 = vmatpush.msra.mxu0 %v34_v3  ;;  %71 = vmatpush.msra.mxu1 %v34_v3 }
   0xa   :  { %42 = vmatpush.msra.mxu0 %v33_v4  ;;  %72 = vmatpush.msra.mxu1 %v33_v4 }
   0xc   :  { %43 = vmatpush.msra.mxu0 %v32_v5  ;;  %73 = vmatpush.msra.mxu1 %v32_v5 }
   0xe   :  { %44 = vmatpush.msra.mxu0 %v31_v6  ;;  %74 = vmatpush.msra.mxu1 %v31_v6 }
  0x10   :  { %45 = vmatpush.msra.mxu0 %v30_v7  ;;  %75 = vmatpush.msra.mxu1 %v30_v7 }
  0x12   :  { %46 = vmatpush.msra.mxu0 %v29_v8  ;;  %76 = vmatpush.msra.mxu1 %v29_v8 }
  0x14   :  { %47 = vmatpush.msra.mxu0 %v28_v9  ;;  %77 = vmatpush.msra.mxu1 %v28_v9 }
  0x16   :  { %48 = vmatpush.msra.mxu0 %v27_v10  ;;  %78 = vmatpush.msra.mxu1 %v27_v10 }
  0x18   :  { %49 = vmatpush.msra.mxu0 %v26_v11  ;;  %79 = vmatpush.msra.mxu1 %v26_v11 }
  0x1a   :  { %50 = vmatpush.msra.mxu0 %v25_v12  ;;  %80 = vmatpush.msra.mxu1 %v25_v12 }
  0x1c   :  { %51 = vmatpush.msra.mxu0 %v24_v13  ;;  %81 = vmatpush.msra.mxu1 %v24_v13 }
  0x1e   :  { %52 = vmatpush.msra.mxu0 %v23_v17  ;;  %82 = vmatpush.msra.mxu1 %v23_v17 }
  0x20   :  { %53 = vmatpush.msra.mxu0 %v22_v18  ;;  %83 = vmatpush.msra.mxu1 %v22_v18 }
  0x21   :  { %54 = vmatmul.f32.vlgmr.msra.gmra.mxu0 %v20_v19  ;;  %57 = vmatmul.f32.vlgmr.msra.gmra.mxu1 %v21_v20 }
  0x9e   :  { %v55_v21 = vpop.f32.mrf.mxu0  ;;  %v58_v22 = vpop.f32.mrf.mxu1 }
  0x9f   :  { %61 = vst [vmem:[%s170_s3] sm:$0xff] %v55_v21 }
  0xa0   :  { %62 = vst [vmem:[%s170_s3 + $0x8] sm:$0xff] %v58_v22 }

</bundles_post_ra>
